<compile_context>
chip_gen: v5e
topology: v5e:2x2
jax: 0.10.0
libtpu: 0.0.40
codegen_flags: <defaults>
</compile_context>

<pallas_src>
import jax
import jax.numpy as jnp
from jax.experimental import pallas as pl
from jax.experimental.pallas import tpu as pltpu


def _bayes_linear_sigmoid_kernel(ew_ref, varw_ref, bias_ref, xT_ref, eps_ref, out_ref):
    xT  = xT_ref[...]        # (D, TN)  f32, batch on lanes
    e_w = ew_ref[...]        # (1, D)   precomputed weight_mu * alpha_q
    v_w = varw_ref[...]      # (1, D)   precomputed alpha_q*(sigma^2 + (1-alpha_q)*mu^2)
    eps = eps_ref[...]       # (1, TN)  lane-dense noise tile
    b_mu   = bias_ref[0]     # scalar (SMEM): bias_mu
    b_sig2 = bias_ref[1]     # scalar (SMEM): bias_sigma^2

    # Local reparameterization trick: two (1,D)x(D,TN) matvecs, contraction on
    # the sublane axis of xT (no operand transpose needed).
    e_b   = jnp.dot(e_w, xT, preferred_element_type=jnp.float32) + b_mu          # (1, TN)
    var_b = jnp.dot(v_w, xT * xT, preferred_element_type=jnp.float32) + b_sig2   # (1, TN)

    act = e_b + jnp.sqrt(var_b) * eps
    out_ref[...] = 1.0 / (1.0 + jnp.exp(-act))   # sigmoid, lane-dense store


def _round_up(x, m):
    return ((x + m - 1) // m) * m


def bayesian_network_forward(x, params, eps=None, *, tile_n=None):
    """Forward of BayesianNetwork (BayesianLinear(p-1, 1) -> sigmoid).

    x   : (N, D) float32 design matrix rows.
    eps : (N, 1) standard-normal draws (training / sample branch); None or zeros
          gives the deterministic eval branch.
    Returns (N, 1) float32 probabilities.
    """
    x = jnp.asarray(x, jnp.float32)
    N, D = x.shape
    if eps is None:
        eps = jnp.zeros((N, 1), jnp.float32)
    eps = jnp.asarray(eps, jnp.float32).reshape(N, 1)

    # ---- hoisted posterior parameterization (O(D), once per forward) ----
    wmu  = params["weight_mu"].astype(jnp.float32).reshape(1, D)
    wrho = params["weight_rho"].astype(jnp.float32).reshape(1, D)
    lam  = params["lambdal"].astype(jnp.float32).reshape(1, D)
    bmu  = params["bias_mu"].astype(jnp.float32).reshape(())
    brho = params["bias_rho"].astype(jnp.float32).reshape(())

    alpha_q = 1.0 / (1.0 + jnp.exp(-lam))
    w_sigma = jnp.log1p(jnp.exp(wrho))
    b_sigma = jnp.log1p(jnp.exp(brho))
    e_w   = wmu * alpha_q                                                # (1, D)
    var_w = alpha_q * (w_sigma * w_sigma + (1.0 - alpha_q) * wmu * wmu)  # (1, D)
    bias_scalars = jnp.stack([bmu, b_sigma * b_sigma])                   # (2,) -> SMEM

    # ---- tiling: batch on lanes, ~2 MiB x tiles, lane-dim multiple of 128 ----
    if tile_n is None:
        tile_n = (2 << 20) // (4 * D)          # ~2 MiB per x tile
        tile_n = max(128, min(tile_n, 1 << 15))
    tile_n = min(tile_n, _round_up(N, 128))
    tile_n = max(128, (tile_n // 128) * 128)
    assert tile_n % 128 == 0
    n_pad = _round_up(N, tile_n)
    grid = (n_pad // tile_n,)

    # Layout plumbing (callers doing many forwards should store x transposed once).
    xT   = jnp.pad(x.T, ((0, 0), (0, n_pad - N)))               # (D, n_pad)
    epsT = jnp.pad(eps.reshape(1, N), ((0, 0), (0, n_pad - N))) # (1, n_pad)

    # VMEM budget: double-buffered x tile + x^2 temp + eps/out tiles + headroom.
    xt_bytes  = tile_n * D * 4
    vec_bytes = tile_n * 4
    vmem_limit = min(max(3 * xt_bytes + 4 * vec_bytes + (8 << 20), 16 << 20), 32 << 20)

    out = pl.pallas_call(
        _bayes_linear_sigmoid_kernel,
        out_shape=jax.ShapeDtypeStruct((1, n_pad), jnp.float32),
        grid_spec=pltpu.PrefetchScalarGridSpec(
            num_scalar_prefetch=0,
            grid=grid,
            in_specs=[
                pl.BlockSpec((1, D), lambda i: (0, 0)),                # e_w   (grid-invariant)
                pl.BlockSpec((1, D), lambda i: (0, 0)),                # var_w (grid-invariant)
                pl.BlockSpec(memory_space=pltpu.MemorySpace.SMEM),     # [bias_mu, bias_sigma^2]
                pl.BlockSpec((D, tile_n), lambda i: (0, i)),           # xT  (batch on lanes)
                pl.BlockSpec((1, tile_n), lambda i: (0, i)),           # eps (lane-dense)
            ],
            out_specs=pl.BlockSpec((1, tile_n), lambda i: (0, i)),     # lane-dense output
        ),
        compiler_params=pltpu.CompilerParams(
            dimension_semantics=("parallel",),
            vmem_limit_bytes=vmem_limit),
    )(e_w, var_w, bias_scalars, xT, epsT)

    return out[:, :N].reshape(N, 1)


def init_params(key, in_features, out_features=1):
    """Deterministic init mirroring BayesianLinear.__init__ uniform ranges."""
    k1, k2, k3, k4, k5 = jax.random.split(key, 5)
    f32 = jnp.float32
    return {
        "weight_mu":  jax.random.uniform(k1, (out_features, in_features), f32, -0.01, 0.01),
        "weight_rho": jax.random.uniform(k2, (out_features, in_features), f32, -5.0, -4.0),
        "lambdal":    jax.random.uniform(k3, (out_features, in_features), f32, 1.5, 2.5),
        "bias_mu":    jax.random.uniform(k4, (out_features,), f32, -0.01, 0.01),
        "bias_rho":   jax.random.uniform(k5, (out_features,), f32, -5.0, -4.0),
    }


def reference_forward(x, params, eps):
    wmu, wrho, lam = params["weight_mu"], params["weight_rho"], params["lambdal"]
    bmu, brho = params["bias_mu"], params["bias_rho"]
    alpha_q = 1.0 / (1.0 + jnp.exp(-lam))
    w_sigma = jnp.log1p(jnp.exp(wrho))
    b_sigma = jnp.log1p(jnp.exp(brho))
    e_w = wmu * alpha_q
    var_w = alpha_q * (w_sigma ** 2 + (1.0 - alpha_q) * wmu ** 2)
    e_b = x @ e_w.T + bmu
    var_b = (x ** 2) @ var_w.T + b_sigma ** 2
    act = e_b + jnp.sqrt(var_b) * eps
    return 1.0 / (1.0 + jnp.exp(-act))


if __name__ == "__main__":
    key = jax.random.PRNGKey(0)
    k_x, k_p, k_eps, k_x2, k_e2 = jax.random.split(key, 5)

    # Small shapes consistent with the module: N rows of the design matrix,
    # D = p - 1 input features.
    N, D = 8, 32
    x = jax.random.normal(k_x, (N, D), jnp.float32)
    params = init_params(k_p, D, 1)
    eps = jax.random.normal(k_eps, (N, 1), jnp.float32)   # sample=True path

    out = jax.block_until_ready(bayesian_network_forward(x, params, eps))
    ref = reference_forward(x, params, eps)
    assert out.shape == (N, 1) and out.dtype == jnp.float32
    assert jnp.allclose(out, ref, atol=2e-5, rtol=2e-5)

    # Eval (sample=False, not training) branch via eps = 0.
    out_eval = jax.block_until_ready(
        bayesian_network_forward(x, params, jnp.zeros((N, 1), jnp.float32)))
    ref_eval = reference_forward(x, params, jnp.zeros((N, 1), jnp.float32))
    assert jnp.allclose(out_eval, ref_eval, atol=2e-5, rtol=2e-5)

    # Multi-step grid + padding path (N not a multiple of the 128-lane tile).
    N2 = 300
    x2 = jax.random.normal(k_x2, (N2, D), jnp.float32)
    eps2 = jax.random.normal(k_e2, (N2, 1), jnp.float32)
    out2 = jax.block_until_ready(
        bayesian_network_forward(x2, params, eps2, tile_n=128))
    ref2 = reference_forward(x2, params, eps2)
    assert out2.shape == (N2, 1)
    assert jnp.allclose(out2, ref2, atol=2e-5, rtol=2e-5)

    print("KERNEL_OK")
</pallas_src>

<mosaic_0001>
module attributes {stable_mosaic.version = 11 : i64} {
  func.func @_bayes_linear_sigmoid_kernel(%arg0: i32, %arg1: memref<1x32xf32, #tpu.memory_space<vmem>>, %arg2: memref<1x32xf32, #tpu.memory_space<vmem>>, %arg3: memref<2xf32, #tpu.memory_space<smem>>, %arg4: memref<32x128xf32, #tpu.memory_space<vmem>>, %arg5: memref<1x128xf32, #tpu.memory_space<vmem>>, %arg6: memref<1x128xf32, #tpu.memory_space<vmem>>) attributes {dimension_semantics = [#tpu.dimension_semantics<parallel>], iteration_bounds = array<i64: 1>, scalar_prefetch = 0 : i64, scratch_operands = 0 : i64, tpu.core_type = #tpu.core_type<tc>, window_params = [{pipeline_mode = #tpu.pipeline_mode<synchronous>, transform_indices = @transform_0, window_bounds = array<i64: 1, 32>}, {pipeline_mode = #tpu.pipeline_mode<synchronous>, transform_indices = @transform_1, window_bounds = array<i64: 1, 32>}, {transform_indices = @transform_2, window_bounds = array<i64: 2>}, {transform_indices = @transform_3, window_bounds = array<i64: 32, 128>}, {transform_indices = @transform_4, window_bounds = array<i64: 1, 128>}, {transform_indices = @transform_5, window_bounds = array<i64: 1, 128>}]} {
    %c0 = arith.constant 0 : index
    %c0_0 = arith.constant 0 : index
    %0 = vector.load %arg4[%c0, %c0_0] : memref<32x128xf32, #tpu.memory_space<vmem>>, vector<32x128xf32>
    %c0_1 = arith.constant 0 : index
    %c0_2 = arith.constant 0 : index
    %1 = vector.load %arg1[%c0_1, %c0_2] : memref<1x32xf32, #tpu.memory_space<vmem>>, vector<1x32xf32>
    %c0_3 = arith.constant 0 : index
    %c0_4 = arith.constant 0 : index
    %2 = vector.load %arg2[%c0_3, %c0_4] : memref<1x32xf32, #tpu.memory_space<vmem>>, vector<1x32xf32>
    %c0_5 = arith.constant 0 : index
    %c0_6 = arith.constant 0 : index
    %3 = vector.load %arg5[%c0_5, %c0_6] : memref<1x128xf32, #tpu.memory_space<vmem>>, vector<1x128xf32>
    %c0_7 = arith.constant 0 : index
    %4 = memref.load %arg3[%c0_7] : memref<2xf32, #tpu.memory_space<smem>>
    %c1 = arith.constant 1 : index
    %5 = memref.load %arg3[%c1] : memref<2xf32, #tpu.memory_space<smem>>
    %cst = arith.constant dense<0.000000e+00> : vector<1x128xf32>
    %6 = tpu.matmul %1, %0, %cst {dimension_numbers = #tpu.dot_dimension_numbers<[1], [0], [0], [1], [0, 0, 1, 1], [], []>} : vector<1x32xf32>, vector<32x128xf32>, vector<1x128xf32> -> vector<1x128xf32>
    %7 = vector.broadcast %4 : f32 to vector<1x128xf32>
    %8 = arith.addf %6, %7 : vector<1x128xf32>
    %9 = arith.mulf %0, %0 : vector<32x128xf32>
    %cst_8 = arith.constant dense<0.000000e+00> : vector<1x128xf32>
    %10 = tpu.matmul %2, %9, %cst_8 {dimension_numbers = #tpu.dot_dimension_numbers<[1], [0], [0], [1], [0, 0, 1, 1], [], []>} : vector<1x32xf32>, vector<32x128xf32>, vector<1x128xf32> -> vector<1x128xf32>
    %11 = vector.broadcast %5 : f32 to vector<1x128xf32>
    %12 = arith.addf %10, %11 : vector<1x128xf32>
    %13 = math.sqrt %12 : vector<1x128xf32>
    %14 = arith.mulf %13, %3 : vector<1x128xf32>
    %15 = arith.addf %8, %14 : vector<1x128xf32>
    %cst_9 = arith.constant 0.000000e+00 : f32
    %16 = vector.broadcast %cst_9 : f32 to vector<1x128xf32>
    %17 = arith.subf %16, %15 : vector<1x128xf32>
    %18 = math.exp %17 : vector<1x128xf32>
    %cst_10 = arith.constant 1.000000e+00 : f32
    %19 = vector.broadcast %cst_10 : f32 to vector<1x128xf32>
    %20 = arith.addf %19, %18 : vector<1x128xf32>
    %cst_11 = arith.constant 1.000000e+00 : f32
    %21 = vector.broadcast %cst_11 : f32 to vector<1x128xf32>
    %22 = arith.divf %21, %20 : vector<1x128xf32>
    %c0_12 = arith.constant 0 : index
    %c0_13 = arith.constant 0 : index
    %23 = vector.load %arg6[%c0_12, %c0_13] : memref<1x128xf32, #tpu.memory_space<vmem>>, vector<1x128xf32>
    tpu.vector_store %arg6[%c0_12, %c0_13], %22 {strides = array<i32>} : memref<1x128xf32, #tpu.memory_space<vmem>>, vector<1x128xf32>,
    return
  }
  func.func @transform_0(%arg0: i32) -> (i32, i32) {
    %c0_i32 = arith.constant 0 : i32
    %c0_i32_0 = arith.constant 0 : i32
    %c0_i32_1 = arith.constant 0 : i32
    return %c0_i32, %c0_i32_0 : i32, i32
  }
  func.func @transform_1(%arg0: i32) -> (i32, i32) {
    %c0_i32 = arith.constant 0 : i32
    %c0_i32_0 = arith.constant 0 : i32
    %c0_i32_1 = arith.constant 0 : i32
    return %c0_i32, %c0_i32_0 : i32, i32
  }
  func.func @transform_2(%arg0: i32) -> i32 {
    %c0_i32 = arith.constant 0 : i32
    %c0_i32_0 = arith.constant 0 : i32
    return %c0_i32 : i32
  }
  func.func @transform_3(%arg0: i32) -> (i32, i32) {
    %c0_i32 = arith.constant 0 : i32
    %c0_i32_0 = arith.constant 0 : i32
    return %c0_i32, %arg0 : i32, i32
  }
  func.func @transform_4(%arg0: i32) -> (i32, i32) {
    %c0_i32 = arith.constant 0 : i32
    %c0_i32_0 = arith.constant 0 : i32
    return %c0_i32, %arg0 : i32, i32
  }
  func.func @transform_5(%arg0: i32) -> (i32, i32) {
    %c0_i32 = arith.constant 0 : i32
    %c0_i32_0 = arith.constant 0 : i32
    return %c0_i32, %arg0 : i32, i32
  }
}

</mosaic_0001>

<bundles_post_ra>
// kernel: tpu_custom_call.1
= control target key start
LH: loop header
LB: loop body
LE: loop exit
PB: predicated region body
PF: predicated region fallthrough
CT: control target
= control target key end

     0   :  { %10 = vsyncpa [#allocation3], 0  ;;  %s381_s0 = inlined_call_operand.hbm [shape: f32[1,32], index: 0, kind: input, shape index: {}]   ;;  %s382_s1 = inlined_call_operand.hbm [shape: f32[1,32], index: 1, kind: input, shape index: {}]   ;;  %s383_s2 = inlined_call_operand.vmem [shape: f32[2], index: 2, kind: input, shape index: {}]   ;;  %s384_s3 = inlined_call_operand.hbm [shape: f32[32,128], index: 3, kind: input, shape index: {}]   ;;  %s385_s4 = inlined_call_operand.vmem [shape: f32[1,128], index: 4, kind: input, shape index: {}]   ;;  %s386_s5 = inlined_call_operand.hbm [shape: f32[1,128], index: 5, kind: output, shape index: {}]  }
   0x1   :  { %11 = vsyncpa [#allocation7], 0 }
   0x2   :  { %12 = vsyncpa [#allocation5], 0  ;;  %s30_s20 = sshll.u32 %s382_s1, 4  ;;  %s31_s20 = int_to_ptr.hbm [resolvable:$true] %s30_s20 }
   0x3   :  { %13 = vsyncpa [#allocation4], 0  ;;  %s326_s21 = smov [#allocation6]   ;;  %s19_s25 = sshll.u32 %s381_s0, 4  ;;  %s20_s25 = int_to_ptr.hbm [resolvable:$true] %s19_s25 }
   0x4   :  { %s32_s22 = sshll.u32 %s326_s21, 4  ;;  %s327_s26 = smov [#allocation2]   ;;  %s33_s22 = int_to_ptr.vmem [resolvable:$true] %s32_s22 }
   0x5   :  { %35 = dma.hbm_to_vmem [thread:$0]  %s31_s20, 16, %s33_s22, [#allocation7]  }
   0x6   :  { %s21_s27 = sshll.u32 %s327_s26, 4  ;;  %s41_s30 = sshll.u32 %s383_s2, 4  ;;  %s22_s27 = int_to_ptr.vmem [resolvable:$true] %s21_s27  ;;  %s42_s30 = int_to_ptr.vmem [resolvable:$true] %s41_s30 }
   0x7   :  { %24 = dma.hbm_to_vmem [thread:$0]  %s20_s25, 16, %s22_s27, [#allocation3]  }
   0x8   :  { %s49_s7 = sshll.u32 %s384_s3, 4  ;;  %s328_s8 = smov [#allocation8]   ;;  %s50_s7 = int_to_ptr.hbm [resolvable:$true] %s49_s7 }
   0x9   :  { %44 = dma.vmem_to_smem %s42_s30, 16, %s328_s8, [#allocation5]  }
   0xa   :  { %s329_s9 = smov [#allocation9]   ;;  %s330_s10 = smov 128  }
   0xb   :  { %s51_s0 = sshll.u32 %s329_s9, 4  ;;  %s331_s11 = smov 8   ;;  %s52_s0 = int_to_ptr.vmem [resolvable:$true] %s51_s0 }
   0xc   :  { %57 = dma.hbm_to_vmem [thread:$0]  %s50_s7, 512, %s52_s0, [#allocation7], %s330_s10, %s330_s10, %s331_s11  }
   0xd   :  { %316 = dma.done.wait [#allocation3], 16  }
   0xe   :  { %317 = vsyncadd [#allocation3], 4294967280 }
   0xf   :  { %318 = dma.done.wait [#allocation7], 16  }
  0x10   :  { %319 = vsyncadd [#allocation7], 4294967280 }
  0x11   :  { %320 = dma.done.wait [#allocation5], 16  }
  0x12   :  { %321 = vsyncadd [#allocation5], 4294967280 }
  0x13   :  { %322 = dma.done.wait [#allocation7], 512  }
  0x14   :  { %323 = vsyncadd [#allocation7], 4294966784 }
  0x15   :  { %76 = sfence }
  0x16   :  { %v80_v0 = vld [vmem:[#allocation9 + $0x18] sm:$0xff]  ;;  %v79_v1 = vld [vmem:[#allocation9 + $0x10] sm:$0xff]  ;;  %v78_v2 = vld [vmem:[#allocation9 + $0x8] sm:$0xff]  ;;  %vm87_vm0 = vcmask 261120   ;;  %s192_s2 = sld [smem:[#allocation8 + $0x1]]  ;;  %s180_s17 = sshll.u32 %s386_s5, 4  ;;  %s181_s17 = int_to_ptr.hbm [resolvable:$true] %s180_s17 }
  0x17   :  { %v114_v3 = vmul.f32 %v80_v0, %v80_v0  ;;  %v113_v4 = vmul.f32 %v79_v1, %v79_v1  ;;  %103 = vmatpush.msra.mxu0 %v80_v0  ;;  %v77_v5 = vld [vmem:[#allocation9] sm:$0xff]  ;;  %v112_v6 = vmul.f32 %v78_v2, %v78_v2  ;;  %v81_v8 = vld [vmem:[#allocation2] sm:$0x1]  ;;  %v82_v9 = vld [vmem:[#allocation6] sm:$0x1]  ;;  %s84_s3 = sld [smem:[#allocation8]] }
  0x18   :  { %v111_v7 = vmul.f32 %v77_v5, %v77_v5  ;;  %v83_v22 = vld [vmem:[%s385_s4] sm:$0x1]  ;;  %s332_s4 = smov [#allocation10]  }
  0x19   :  { %131 = vmatpush.msra.mxu1 %v114_v3  ;;  %104 = vmatpush.msra.mxu0 %v79_v1  ;;  %s178_s14 = sshll.u32 %s332_s4, 4  ;;  %s179_s14 = int_to_ptr.vmem [resolvable:$true] %s178_s14 }
  0x1b   :  { %132 = vmatpush.msra.mxu1 %v113_v4  ;;  %105 = vmatpush.msra.mxu0 %v78_v2 }
  0x1c   :  { %v115_v10 = vstv %s192_s2 }
  0x1d   :  { %133 = vmatpush.msra.mxu1 %v112_v6  ;;  %106 = vmatpush.msra.mxu0 %v77_v5  ;;  %v86_v19 = vstv %s84_s3 }
  0x1e   :  { %193 = vmatmul.msk.f32.vlgmr.msra.gmra.mxu0 %vm87_vm0, %v81_v8 }
  0x1f   :  { %134 = vmatpush.msra.mxu1 %v111_v7 }
  0x20   :  { %194 = vmatmul.msk.f32.vlgmr.msra.gmra.mxu1 %vm87_vm0, %v82_v9 }
  0x9b   :  { %v108_v20 = vpop.f32.mrf.mxu0 }
  0x9c   :  { %v109_v24 = vadd.f32 %v108_v20, %v86_v19 }
  0x9d   :  { %v136_v11 = vpop.f32.mrf.mxu1 }
  0x9e   :  { %v137_v12 = vadd.f32 %v136_v11, %v115_v10 }
  0xa0   :  { %202 = vrsqrt.f32 %v137_v12  ;;  %vm146_vm1 = vcmp.eq.f32.partialorder %v137_v12, inf  ;;  %v149_v23 = vand.u32 2147483648, %v137_v12  ;;  %vm148_vm2 = vcmp.eq.f32.partialorder %v137_v12, 0.0 }
  0xa6   :  { %v203_v13 = vpop.eup %202 }
  0xa7   :  { %v140_v14 = vmul.f32 %v203_v13, %v137_v12 }
  0xa9   :  { %v141_v15 = vmul.f32 %v203_v13, %v140_v14 }
  0xab   :  { %v142_v16 = vmul.f32 0.5, %v141_v15 }
  0xad   :  { %v143_v17 = vsub.f32 1.5, %v142_v16 }
  0xaf   :  { %v144_v18 = vmul.f32 %v203_v13, %v143_v17 }
  0xb1   :  { %v145_v21 = vmul.f32 %v144_v18, %v137_v12 }
  0xb3   :  { %v147_v25 = vsel %vm146_vm1, %v137_v12, %v145_v21 }
  0xb4   :  { %v150_v26 = vsel %vm148_vm2, %v149_v23, %v147_v25 }
  0xb5   :  { %v151_v27 = vmul.f32 %v150_v26, %v83_v22 }
  0xb7   :  { %v152_v28 = vadd.f32 %v151_v27, %v109_v24 }
  0xb9   :  { %v153_v29 = vsub.f32 0.0, %v152_v28 }
  0xbb   :  { %v154_v30 = vmul.f32 1.442695, %v153_v29 }
  0xbd   :  { %204 = vpow2.f32 %v154_v30 }
  0xc3   :  { %v205_v31 = vpop.eup %204 }
  0xc4   :  { %v156_v32 = vadd.f32 1.0, %v205_v31 }
  0xc6   :  { %206 = vrcp.f32 %v156_v32  ;;  %v168_v36 = vand.u32 2147483648, %v156_v32  ;;  %v166_v38 = vand.u32 2147483647, %v156_v32  ;;  %vm162_vm4 = vweird.f32 %v156_v32 }
  0xc8   :  { %v169_v40 = vor.u32 1.1754944e-38, %v168_v36  ;;  %vm167_vm6 = vcmp.eq.f32.partialorder %v166_v38, 8.507059e+37 }
  0xcc   :  { %v207_v33 = vpop.eup %206 }
  0xcd   :  { %v158_v34 = vmul.f32 %v207_v33, %v156_v32  ;;  %vm163_vm3 = vweird.f32 %v207_v33 }
  0xce   :  { %vm164_vm5 = vmor %vm162_vm4, %vm163_vm3 }
  0xcf   :  { %v159_v35 = vsub.f32 1.0, %v158_v34 }
  0xd1   :  { %v160_v37 = vmul.f32 %v207_v33, %v159_v35 }
  0xd3   :  { %v161_v39 = vadd.f32 %v207_v33, %v160_v37 }
  0xd5   :  { %v165_v41 = vsel %vm164_vm5, %v207_v33, %v161_v39 }
  0xd6   :  { %v170_v42 = vsel %vm167_vm6, %v169_v40, %v165_v41 }
  0xd7   :  { %172 = vst [vmem:[#allocation10] sm:$0x1] %v170_v42 }
  0xd8   :  { %183 = dma.vmem_to_hbm [thread:$0]  %s179_s14, 16, %s181_s17, [#allocation4]  }
  0xd9   :  { %324 = dma.done.wait [#allocation4], 16  }
  0xda   :  { %325 = vsyncadd [#allocation4], 4294967280 }
  0xdb   :  { %188 = vsyncpa [#allocation3], 1 }
  0xdc   :  { %189 = vsyncpa [#allocation7], 1 }
  0xdd   :  { %190 = vsyncpa [#allocation4], 1 }
  0xde   :  { %191 = vsyncpa [#allocation5], 1 }

</bundles_post_ra>
